<compile_context>
chip_gen: v7x
topology: tpu7x:2x2x1
jax: 0.10.0
libtpu: 0.0.40
codegen_flags: <defaults>
</compile_context>

<pallas_src>
import functools

import jax
import jax.numpy as jnp
from jax.experimental import pallas as pl
from jax.experimental.pallas import tpu as pltpu


def _largest_divisor_leq(n, cap):
    for d in range(min(n, cap), 0, -1):
        if n % d == 0:
            return d
    return 1


def _pick_spatial_tile(hw, batch_block, c, itemsize, requested=None,
                       per_buffer_budget=4 * 1024 * 1024):
    """Largest lane-aligned spatial tile that divides H*W and fits the budget."""
    if requested is not None:
        ok = (requested == hw) or (hw % requested == 0 and requested % 128 == 0)
        if not ok:
            raise ValueError(
                "spatial_tile must equal H*W, or divide H*W and be a multiple "
                "of 128")
        return requested
    if hw % 128 != 0:
        return hw  # small / odd spatial extent: one full-width block
    max_t = per_buffer_budget // max(1, batch_block * c * itemsize)
    max_t = max(128, (max_t // 128) * 128)
    if hw <= max_t:
        return hw
    t = max_t
    while hw % t != 0:
        t -= 128
    return t


def _mc_exit_kernel(x_ref, w1_ref, b1_ref, w2_ref, b2_ref, mask_ref, o_ref,
                    acc_ref, *, inv_hw):
    k = pl.program_id(1)

    # --- init the pooling accumulator at the first spatial tile ---
    @pl.when(k == 0)
    def _():
        acc_ref[...] = jnp.zeros_like(acc_ref)

    # --- AdaptiveAvgPool2d(1): accumulate the spatial sum in f32 ---
    acc_ref[...] += jnp.sum(x_ref[...], axis=-1, dtype=jnp.float32)

    # --- last spatial tile: finish the pool + dense head, write output ---
    @pl.when(k == pl.num_programs(1) - 1)
    def _():
        pooled = acc_ref[...] * inv_hw                               # [nb, C]

        # Linear(C, H1) + ReLU  (tiny MXU op; runtime is set by streaming x)
        h = jnp.dot(pooled, w1_ref[...].astype(jnp.float32),
                    preferred_element_type=jnp.float32)              # [nb, H1]
        h = jnp.maximum(h + b1_ref[...].astype(jnp.float32), 0.0)

        # MCDropout(p) (always active): pre-scaled keep mask, one multiply.
        h = h * mask_ref[0]                                          # [nb, H1]

        # Linear(H1, O)
        out = jnp.dot(h, w2_ref[...].astype(jnp.float32),
                      preferred_element_type=jnp.float32)            # [nb, O]
        out = out + b2_ref[...].astype(jnp.float32)

        o_ref[...] = out[None].astype(o_ref.dtype)                   # [1,nb,O]


def mc_exit_block(x, w1, b1, w2, b2, key, p_dropout, *,
                  batch_block=None, spatial_tile=None):
    """x: [N, C, H, W] (NCHW).  w1: [C, H1], b1: [H1], w2: [H1, O], b2: [O]."""
    N, C, H, W = x.shape
    H1 = w1.shape[1]
    O = w2.shape[1]
    HW = H * W
    p = float(p_dropout)

    # --- tiling ---
    nb = batch_block if batch_block is not None else _largest_divisor_leq(N, 8)
    if N % nb != 0:
        raise ValueError("batch_block must divide N")
    nbb = N // nb
    tile_hw = _pick_spatial_tile(HW, nb, C, x.dtype.itemsize,
                                 requested=spatial_tile)
    n_spatial = HW // tile_hw

    # --- glue reshapes (contiguous, free) ---
    x3 = x.reshape(N, C, HW)
    b1_2d = b1.reshape(1, H1)
    b2_2d = b2.reshape(1, O)

    # MC dropout keep-mask, pre-scaled by 1/(1-p).  Vary `key` per forward.
    if p <= 0.0:
        mask = jnp.ones((N, H1), jnp.float32)
    elif p >= 1.0:
        mask = jnp.zeros((N, H1), jnp.float32)
    else:
        keep = jax.random.bernoulli(key, 1.0 - p, (N, H1))
        mask = keep.astype(jnp.float32) * (1.0 / (1.0 - p))
    mask3 = mask.reshape(nbb, nb, H1)

    kernel = functools.partial(_mc_exit_kernel, inv_hw=1.0 / float(HW))

    out3 = pl.pallas_call(
        kernel,
        out_shape=jax.ShapeDtypeStruct((nbb, nb, O), x.dtype),
        grid=(nbb, n_spatial),                                 # reduction last
        in_specs=[
            pl.BlockSpec((nb, C, tile_hw), lambda i, k: (i, 0, k)),   # x
            pl.BlockSpec((C, H1), lambda i, k: (0, 0)),               # w1
            pl.BlockSpec((1, H1), lambda i, k: (0, 0)),               # b1
            pl.BlockSpec((H1, O), lambda i, k: (0, 0)),               # w2
            pl.BlockSpec((1, O), lambda i, k: (0, 0)),                # b2
            pl.BlockSpec((1, nb, H1), lambda i, k: (i, 0, 0)),        # mask
        ],
        out_specs=pl.BlockSpec((1, nb, O), lambda i, k: (i, 0, 0)),
        scratch_shapes=[pltpu.VMEM((nb, C), jnp.float32)],            # pool acc
        compiler_params=pltpu.CompilerParams(
            dimension_semantics=("parallel", "arbitrary"),
            vmem_limit_bytes=32 * 1024 * 1024,   # safe on v5e/v6e/v7x
        ),
    )(x3, w1, b1_2d, w2, b2_2d, mask3)

    return out3.reshape(N, O)


if __name__ == "__main__":
    # Shapes consistent with the module:
    # in_channels=4, hidden_sizes=32, out_channels=10, p_dropout=0.1
    N, C, H, W = 2, 4, 16, 16
    HIDDEN, OUT = 32, 10
    P_DROPOUT = 0.1

    key = jax.random.PRNGKey(0)
    kx, kw1, kb1, kw2, kb2 = jax.random.split(key, 5)
    drop_key = jax.random.PRNGKey(1234)

    x = jax.random.normal(kx, (N, C, H, W), dtype=jnp.float32)
    # Linear weights stored as [in, out].
    w1 = jax.random.normal(kw1, (C, HIDDEN), dtype=jnp.float32) * 0.1
    b1 = jax.random.normal(kb1, (HIDDEN,), dtype=jnp.float32) * 0.1
    w2 = jax.random.normal(kw2, (HIDDEN, OUT), dtype=jnp.float32) * 0.1
    b2 = jax.random.normal(kb2, (OUT,), dtype=jnp.float32) * 0.1

    # Small blocks on purpose so the demo exercises the whole pipeline:
    # grid = (2 batch blocks ["parallel"], 2 spatial tiles ["arbitrary"]).
    out = mc_exit_block(x, w1, b1, w2, b2, key=drop_key, p_dropout=P_DROPOUT,
                        batch_block=1, spatial_tile=128)
    out = jax.block_until_ready(out)

    assert out.shape == (N, OUT), out.shape
    assert bool(jnp.all(jnp.isfinite(out)))

    # Pure-JAX reference with the identical dropout mask.
    pooled = jnp.mean(x.astype(jnp.float32).reshape(N, C, H * W), axis=-1)
    h_ref = jnp.maximum(pooled @ w1 + b1, 0.0)
    keep_ref = jax.random.bernoulli(drop_key, 1.0 - P_DROPOUT,
                                    (N, HIDDEN)).astype(jnp.float32)
    ref = (h_ref * keep_ref / (1.0 - P_DROPOUT)) @ w2 + b2
    assert bool(jnp.allclose(out, ref, rtol=2e-2, atol=2e-2))

    print("KERNEL_OK")
</pallas_src>

<mosaic_0001>
module attributes {stable_mosaic.version = 11 : i64} {
  func.func @_mc_exit_kernel(%arg0: i32, %arg1: i32, %arg2: memref<1x4x128xf32, #tpu.memory_space<vmem>>, %arg3: memref<4x32xf32, #tpu.memory_space<vmem>>, %arg4: memref<1x32xf32, #tpu.memory_space<vmem>>, %arg5: memref<32x10xf32, #tpu.memory_space<vmem>>, %arg6: memref<1x10xf32, #tpu.memory_space<vmem>>, %arg7: memref<1x1x32xf32, #tpu.memory_space<vmem>>, %arg8: memref<1x1x10xf32, #tpu.memory_space<vmem>>, %arg9: memref<1x4xf32, #tpu.memory_space<vmem>>) attributes {dimension_semantics = [#tpu.dimension_semantics<parallel>, #tpu.dimension_semantics<arbitrary>], iteration_bounds = array<i64: 2, 2>, scalar_prefetch = 0 : i64, scratch_operands = 1 : i64, tpu.core_type = #tpu.core_type<tc>, window_params = [{transform_indices = @transform_0, window_bounds = array<i64: 1, 4, 128>}, {pipeline_mode = #tpu.pipeline_mode<synchronous>, transform_indices = @transform_1, window_bounds = array<i64: 4, 32>}, {pipeline_mode = #tpu.pipeline_mode<synchronous>, transform_indices = @transform_2, window_bounds = array<i64: 1, 32>}, {pipeline_mode = #tpu.pipeline_mode<synchronous>, transform_indices = @transform_3, window_bounds = array<i64: 32, 10>}, {pipeline_mode = #tpu.pipeline_mode<synchronous>, transform_indices = @transform_4, window_bounds = array<i64: 1, 10>}, {transform_indices = @transform_5, window_bounds = array<i64: 1, 1, 32>}, {transform_indices = @transform_6, window_bounds = array<i64: 1, 1, 10>}]} {
    %c0_i32 = arith.constant 0 : i32
    %0 = arith.cmpi eq, %arg1, %c0_i32 : i32
    %1 = arith.extui %0 : i1 to i32
    %c0_i32_0 = arith.constant 0 : i32
    %2 = arith.cmpi ne, %1, %c0_i32_0 : i32
    scf.if %2 {
      %cst_8 = arith.constant 0.000000e+00 : f32
      %11 = vector.broadcast %cst_8 : f32 to vector<1x4xf32>
      %c0_9 = arith.constant 0 : index
      %c0_10 = arith.constant 0 : index
      %12 = vector.load %arg9[%c0_9, %c0_10] : memref<1x4xf32, #tpu.memory_space<vmem>>, vector<1x4xf32>
      tpu.vector_store %arg9[%c0_9, %c0_10], %11 {strides = array<i32>} : memref<1x4xf32, #tpu.memory_space<vmem>>, vector<1x4xf32>,
    } else {
    }
    %c0 = arith.constant 0 : index
    %c0_1 = arith.constant 0 : index
    %3 = vector.load %arg9[%c0, %c0_1] : memref<1x4xf32, #tpu.memory_space<vmem>>, vector<1x4xf32>
    %c0_2 = arith.constant 0 : index
    %c0_3 = arith.constant 0 : index
    %c0_4 = arith.constant 0 : index
    %4 = vector.load %arg2[%c0_2, %c0_3, %c0_4] : memref<1x4x128xf32, #tpu.memory_space<vmem>>, vector<1x4x128xf32>
    %cst = arith.constant dense<0.000000e+00> : vector<1x4xf32>
    %5 = vector.multi_reduction <add>, %4, %cst [2] : vector<1x4x128xf32> to vector<1x4xf32>
    %6 = arith.addf %3, %5 : vector<1x4xf32>
    %c0_5 = arith.constant 0 : index
    %c0_6 = arith.constant 0 : index
    %7 = vector.load %arg9[%c0_5, %c0_6] : memref<1x4xf32, #tpu.memory_space<vmem>>, vector<1x4xf32>
    tpu.vector_store %arg9[%c0_5, %c0_6], %6 {strides = array<i32>} : memref<1x4xf32, #tpu.memory_space<vmem>>, vector<1x4xf32>,
    %c1_i32 = arith.constant 1 : i32
    %8 = arith.cmpi eq, %arg1, %c1_i32 : i32
    %9 = arith.extui %8 : i1 to i32
    %c0_i32_7 = arith.constant 0 : i32
    %10 = arith.cmpi ne, %9, %c0_i32_7 : i32
    scf.if %10 {
      %c0_8 = arith.constant 0 : index
      %c0_9 = arith.constant 0 : index
      %11 = vector.load %arg9[%c0_8, %c0_9] : memref<1x4xf32, #tpu.memory_space<vmem>>, vector<1x4xf32>
      %cst_10 = arith.constant 3.906250e-03 : f32
      %12 = vector.broadcast %cst_10 : f32 to vector<1x4xf32>
      %13 = arith.mulf %11, %12 : vector<1x4xf32>
      %c0_11 = arith.constant 0 : index
      %c0_12 = arith.constant 0 : index
      %14 = vector.load %arg3[%c0_11, %c0_12] : memref<4x32xf32, #tpu.memory_space<vmem>>, vector<4x32xf32>
      %cst_13 = arith.constant dense<0.000000e+00> : vector<1x32xf32>
      %15 = tpu.matmul %13, %14, %cst_13 {dimension_numbers = #tpu.dot_dimension_numbers<[1], [0], [0], [1], [0, 0, 1, 1], [], []>} : vector<1x4xf32>, vector<4x32xf32>, vector<1x32xf32> -> vector<1x32xf32>
      %c0_14 = arith.constant 0 : index
      %c0_15 = arith.constant 0 : index
      %16 = vector.load %arg4[%c0_14, %c0_15] : memref<1x32xf32, #tpu.memory_space<vmem>>, vector<1x32xf32>
      %17 = arith.addf %15, %16 : vector<1x32xf32>
      %cst_16 = arith.constant 0.000000e+00 : f32
      %18 = vector.broadcast %cst_16 : f32 to vector<1x32xf32>
      %19 = arith.maximumf %17, %18 : vector<1x32xf32>
      %c0_17 = arith.constant 0 : index
      %c0_18 = arith.constant 0 : index
      %c0_19 = arith.constant 0 : index
      %20 = vector.load %arg7[%c0_17, %c0_18, %c0_19] : memref<1x1x32xf32, #tpu.memory_space<vmem>>, vector<1x1x32xf32>
      %21 = vector.shape_cast %20 : vector<1x1x32xf32> to vector<1x32xf32>
      %22 = arith.mulf %19, %21 : vector<1x32xf32>
      %c0_20 = arith.constant 0 : index
      %c0_21 = arith.constant 0 : index
      %23 = vector.load %arg5[%c0_20, %c0_21] : memref<32x10xf32, #tpu.memory_space<vmem>>, vector<32x10xf32>
      %cst_22 = arith.constant dense<0.000000e+00> : vector<1x10xf32>
      %24 = tpu.matmul %22, %23, %cst_22 {dimension_numbers = #tpu.dot_dimension_numbers<[1], [0], [0], [1], [0, 0, 1, 1], [], []>} : vector<1x32xf32>, vector<32x10xf32>, vector<1x10xf32> -> vector<1x10xf32>
      %c0_23 = arith.constant 0 : index
      %c0_24 = arith.constant 0 : index
      %25 = vector.load %arg6[%c0_23, %c0_24] : memref<1x10xf32, #tpu.memory_space<vmem>>, vector<1x10xf32>
      %26 = arith.addf %24, %25 : vector<1x10xf32>
      %27 = vector.shape_cast %26 : vector<1x10xf32> to vector<1x1x10xf32>
      %c0_25 = arith.constant 0 : index
      %c0_26 = arith.constant 0 : index
      %c0_27 = arith.constant 0 : index
      %28 = vector.load %arg8[%c0_25, %c0_26, %c0_27] : memref<1x1x10xf32, #tpu.memory_space<vmem>>, vector<1x1x10xf32>
      tpu.vector_store %arg8[%c0_25, %c0_26, %c0_27], %27 {strides = array<i32>} : memref<1x1x10xf32, #tpu.memory_space<vmem>>, vector<1x1x10xf32>,
    } else {
    }
    return
  }
  func.func @transform_0(%arg0: i32, %arg1: i32) -> (i32, i32, i32) {
    %c0_i32 = arith.constant 0 : i32
    %c0_i32_0 = arith.constant 0 : i32
    return %arg0, %c0_i32, %arg1 : i32, i32, i32
  }
  func.func @transform_1(%arg0: i32, %arg1: i32) -> (i32, i32) {
    %c0_i32 = arith.constant 0 : i32
    %c0_i32_0 = arith.constant 0 : i32
    %c0_i32_1 = arith.constant 0 : i32
    return %c0_i32, %c0_i32_0 : i32, i32
  }
  func.func @transform_2(%arg0: i32, %arg1: i32) -> (i32, i32) {
    %c0_i32 = arith.constant 0 : i32
    %c0_i32_0 = arith.constant 0 : i32
    %c0_i32_1 = arith.constant 0 : i32
    return %c0_i32, %c0_i32_0 : i32, i32
  }
  func.func @transform_3(%arg0: i32, %arg1: i32) -> (i32, i32) {
    %c0_i32 = arith.constant 0 : i32
    %c0_i32_0 = arith.constant 0 : i32
    %c0_i32_1 = arith.constant 0 : i32
    return %c0_i32, %c0_i32_0 : i32, i32
  }
  func.func @transform_4(%arg0: i32, %arg1: i32) -> (i32, i32) {
    %c0_i32 = arith.constant 0 : i32
    %c0_i32_0 = arith.constant 0 : i32
    %c0_i32_1 = arith.constant 0 : i32
    return %c0_i32, %c0_i32_0 : i32, i32
  }
  func.func @transform_5(%arg0: i32, %arg1: i32) -> (i32, i32, i32) {
    %c0_i32 = arith.constant 0 : i32
    %c0_i32_0 = arith.constant 0 : i32
    %c0_i32_1 = arith.constant 0 : i32
    return %arg0, %c0_i32, %c0_i32_0 : i32, i32, i32
  }
  func.func @transform_6(%arg0: i32, %arg1: i32) -> (i32, i32, i32) {
    %c0_i32 = arith.constant 0 : i32
    %c0_i32_0 = arith.constant 0 : i32
    %c0_i32_1 = arith.constant 0 : i32
    return %arg0, %c0_i32, %c0_i32_0 : i32, i32, i32
  }
}

</mosaic_0001>

<bundles_post_ra>
// kernel: tpu_custom_call.1
= control target key start
LH: loop header
LB: loop body
LE: loop exit
PB: predicated region body
PF: predicated region fallthrough
CT: control target
= control target key end

     0   :  { %11 = vsyncpa [#allocation4], 0  ;;  %s1062_s0 = inlined_call_operand.vmem [shape: f32[2,4,256], index: 0, kind: input, shape index: {}]   ;;  %s1063_s1 = inlined_call_operand.vmem [shape: f32[4,32], index: 1, kind: input, shape index: {}]   ;;  %s1064_s2 = inlined_call_operand.vmem [shape: f32[1,32], index: 2, kind: input, shape index: {}]   ;;  %s1065_s3 = inlined_call_operand.vmem [shape: f32[32,10], index: 3, kind: input, shape index: {}]   ;;  %s1066_s4 = inlined_call_operand.vmem [shape: f32[1,10], index: 4, kind: input, shape index: {}]   ;;  %s1067_s5 = inlined_call_operand.vmem [shape: f32[2,1,32], index: 5, kind: input, shape index: {}]   ;;  %s1068_s6 = inlined_call_operand.hbm [shape: f32[2,1,10], index: 6, kind: output, shape index: {}]  }
   0x1   :  { %13 = vsyncpa [#allocation4 + $0x1], 0  ;;  %s889_s21 = smov 0   ;;  %s891_s22 = smov 0  }
   0x2   :  { %s893_s23 = smov 0   ;;  %s895_s24 = smov 0  }
   0x3   :  { %s897_s25 = smov 0   ;;  %s899_s26 = smov 0  }
   0x4   :  { %s901_s27 = smov 0   ;;  %s903_s28 = smov 0  }
   0x5 LB: > { %s629_s29 = sadd.s32 4294967295, %s845_s28   ;;  %s630_s30 = sadd.s32 4294967294, %s845_s28   ;;  %s845_s28 = sphi %s903_s28, %s19_s28   ;;  %s841_s27 = sphi %s901_s27, %s1082_s27   ;;  %s837_s26 = sphi %s899_s26, %s1081_s26   ;;  %s833_s25 = sphi %s897_s25, %s1080_s25   ;;  %s829_s24 = sphi %s895_s24, %s1079_s24   ;;  %s825_s23 = sphi %s893_s23, %s1078_s23   ;;  %s821_s22 = sphi %s891_s22, %s1077_s22   ;;  %s817_s21 = sphi %s889_s21, %s1076_s21  }
   0x6   : > { %s28_s7 = sadd.s32 1, %s837_s26  ;;  %s31_s8 = sadd.s32 1, %s841_s27 }
   0x7   : > { %p29_p0 = scmp.ge.s32.totalorder %s28_s7, 2  ;;  %p186_p1 = scmp.ne.s32.totalorder %s825_s23, %s821_s22 }
   0x8   : > { %p187_p2 = scmp.eq.s32.totalorder %s629_s29, 3  ;;  %p192_p4 = scmp.ne.s32.totalorder %s821_s22, %s817_s21 }
   0x9   : > { %s1084_s7 = smov (%p29_p0, %s28_s7), 0  ;;  %s1086_s8 = smov (!%p29_p0, %s31_s8), %s841_s27 }
   0xa   : > { %1070 = sst [smem:[#allocation6_spill]] %s1084_s7  ;;  %p938_p3 = por %p187_p2, %p186_p1 }
   0xb   : > { %p33_p5 = scmp.ge.s32.totalorder %s1086_s8, 2  ;;  %p193_p6 = scmp.eq.s32.totalorder %s630_s30, 3 }
   0xc   : > { %p633_p7 = scmp.ge.s32.totalorder %s845_s28, 1  ;;  %p240_p8 = scmp.lt.s32.totalorder %s845_s28, 5 }
   0xd   : > { %s1088_s8 = smov (%p33_p5, %s1086_s8), 0  ;;  %p948_p9 = por %p193_p6, %p192_p4 }
   0xe   : > { %1072 = sst [smem:[#allocation7_spill]] %s1088_s8  ;;  %p241_p10 = pnand %p633_p7, %p240_p8 }
   0xf   : > { %s173_s11 = ssub.s32 %s841_s27, %s1088_s8  ;;  %s176_s12 = sadd.s32 1, %s825_s23 }
  0x10   : > { %p174_p11 = scmp.eq.s32.totalorder %s173_s11, 0  ;;  %244 = sbr.rel (%p241_p10) target bundleno = 790 (0x316), region = 44 }
  0x11   : > { %s273_s14 = sand.u32 (!%p241_p10), 1, %s821_s22   ;;  %p275_p12 = scmp.lt.s32.totalorder (!%p241_p10), %s833_s25, 1 }
  0x12   : > { %s956_s13 = scalar_select %p174_p11, %s825_s23, %s176_s12  }
  0x13   : > { %p277_p13 = scmp.lt.s32.totalorder (!%p241_p10), %s829_s24, 1  ;;  %s975_s7 = scalar_lea.vmem (!%p241_p10), [#allocation3], %s273_s14 }
  0x14   : > { %p636_p0 = scmp.ne.s32.totalorder (!%p241_p10), %s829_s24, 0 }
  0x17   : > { %s962_s15 = scalar_select %p275_p12, %s833_s25, 1 }
  0x18   : > { %s278_s16 = scalar_select %p277_p13, %s829_s24, 1 }
  0x19   : > { %s634_s17 = sshll.u32 %s962_s15, 1  ;;  %s285_s20 = scalar_lea.vmem %s1067_s5, %s962_s15  ;;  %vm290_vm0 = vcmask (!%p636_p0), 24576   ;;  %v847_v0 = vmov (!%p636_p0), 0.0  }
  0x1a   : > { %s280_s29 = sadd.s32 %s634_s17, %s278_s16  ;;  %289 = sbr.rel (%p636_p0) target bundleno = 33 (0x21), region = 48  ;;  %291 = vst.msk [vmem:[#allocation2] sm:$0x1] (!%p636_p0), %vm290_vm0, %v847_v0 }
  0x1b   : > { %s635_s30 = sshll.u32 %s280_s29, 2 }
  0x1c   : > { %s282_s8 = scalar_lea.vmem %s1062_s0, %s635_s30 }
  0x21 PF: > { %v293_v1 = vld [vmem:[%s282_s8] sm:$0xf]  ;;  %vm294_vm1 = vcmask 1043456   ;;  %v848_v3 = vmov 0   ;;  %v299_v4 = vlaneseq  ;;  %v849_v8 = vmov 1966171168  }
  0x22   : > { %v295_v2 = vsel %vm294_vm1, %v293_v1, 0.0  ;;  %750 = vset.pattern.permute.xlu0 %v848_v3  ;;  %v318_v9 = vunpack.c.l.s4 %v849_v8  ;;  %v292_v30 = vld [vmem:[#allocation2] sm:$0x1]  ;;  %vm364_vm2 = vcmask 24576   ;;  %p637_p1 = scmp.ne.s32.totalorder %s829_s24, 1 }
  0x23   : > { %296 = vadd.xlane.f32.xlu0 %v295_v2  ;;  %v300_v5 = vshrl.u32 %v299_v4, 7  ;;  %v343_v6 = vand.u32 127, %v299_v4  ;;  %v372_v33 = vld [vmem:[%s1063_s1] sm:$0xf] (!%p637_p1)  ;;  %v850_v35 = vmov (!%p637_p1), 0.0   ;;  %vm851_vm3 = vmmov (!%p637_p1), 0  }
  0x24   : > { %v319_v10 = vunpack.c.0.s8 %v318_v9  ;;  %651 = vmatprep.subr.mxu0 (!%p637_p1), %v850_v35  ;;  %653 = vmatprep.mubr.msk.f32.mxu0 (!%p637_p1), %vm851_vm3, %v850_v35  ;;  %vm374_vm4 = vcmask (!%p637_p1), 31744   ;;  %v852_v37 = vmov (!%p637_p1), 0.0|0.0   ;;  %v454_v38 = vld [vmem:[%s1065_s3] sm:$0xff] (!%p637_p1)  ;;  %v455_v39 = vld [vmem:[%s1065_s3 + $0x8] sm:$0xff] (!%p637_p1)  ;;  %v456_v41 = vld [vmem:[%s1065_s3 + $0x10] sm:$0xff] (!%p637_p1)  ;;  %vm459_vm5 = vcmask (!%p637_p1), 261120  }
  0x25   : > { %v346_v7 = vsub.s32 %v343_v6, %v300_v5  ;;  %v301_v11 = vsub.s32 0, %v300_v5  ;;  %v305_v12 = vsub.s32 1, %v300_v5  ;;  %v309_v13 = vsub.s32 2, %v300_v5  ;;  %652 = vmatpush3.msk.msra.mxu0 (!%p637_p1), %vm294_vm1, %v372_v33  ;;  %667 = vmatprep.subr.bf16.mxu1 (!%p637_p1), %v852_v37  ;;  %v457_v42 = vld [vmem:[%s1065_s3 + $0x18] sm:$0xff] (!%p637_p1)  ;;  %v373_v44 = vld [vmem:[%s1064_s2] sm:$0x1] (!%p637_p1) }
  0x26   : > { %v313_v14 = vsub.s32 3, %v300_v5  ;;  %v322_v16 = vsub.s32 %v319_v10, %v300_v5  ;;  %664 = vmatprep.mubr.msk.f32.mxu1 (!%p637_p1), %vm851_vm3, %v850_v35  ;;  %v668_v40 = vpack.c.bf16 (!%p637_p1), %v455_v39, %v454_v38  ;;  %v671_v43 = vpack.c.bf16 (!%p637_p1), %v457_v42, %v456_v41  ;;  %v452_v48 = vld [vmem:[%s285_s20] sm:$0x1] (!%p637_p1) }
  0x27   : > { %v458_v51 = vld [vmem:[%s1066_s4] sm:$0x1] (!%p637_p1)  ;;  %vm533_vm6 = vcmask (!%p637_p1), 73728  }
  0x28   : > { %669 = vmatpush3.bf16.msra.mxu1 (!%p637_p1), %v668_v40 }
  0x29   : > { %670 = vmatprep.subr.bf16.mxu1 (!%p637_p1), %v852_v37 }
  0x2c   : > { %672 = vmatpush3.bf16.msra.mxu1 (!%p637_p1), %v671_v43 }
  0xb0   : > { %v297_v15 = vpop.xlane.xlu0 %296 }
  0xb1   : > { %v302_v17 = vrot.slane %v297_v15, %v301_v11  ;;  %v306_v18 = vrot.slane %v297_v15, %v305_v12  ;;  %v310_v19 = vrot.slane %v297_v15, %v309_v13  ;;  %v314_v20 = vrot.slane %v297_v15, %v313_v14 }
  0xb3   : > { %v315_v21 = vcombine.low %v302_v17, %v306_v18  ;;  %v316_v22 = vcombine.low %v310_v19, %v314_v20 }
  0xb5   : > { %v323_v23 = vrot.slane %v315_v21, %v322_v16  ;;  %v330_v24 = vrot.slane %v316_v22, %v322_v16 }
  0xb7   : > { %v331_v25 = vcombine.low %v323_v23, %v330_v24 }
  0xb9   : > { %v338_v26 = vrot.slane %v331_v25, %v322_v16 }
  0xbb   : > { %340 = vperm.xlu0 %750, %v338_v26  }
 0x13a   : > { %v341_v27 = vpop.permute.xlu0 %340 }
 0x13b   : > { %v347_v28 = vrot.slane %v341_v27, %v346_v7 }
 0x13d   : > { %v354_v29 = vrot.slane %v347_v28, %v322_v16  ;;  %369 = sbr.rel (%p637_p1) target bundleno = 766 (0x2fe), region = 52 }
 0x13f   : > { %v361_v31 = vrot.slane %v354_v29, %v322_v16 }
 0x141   : > { %v363_v32 = vadd.f32 %v361_v31, %v292_v30 }
 0x143   : > { %365 = vst.msk [vmem:[#allocation2] sm:$0x1] %vm364_vm2, %v363_v32 }
 0x14a   : > { %v370_v34 = vld [vmem:[#allocation2] sm:$0x1] }
 0x14b   : > { %v371_v36 = vmul.f32 0.00390625, %v370_v34 }
 0x14d   : > { %654 = vmatmul.mubr.msk.f32.vlgmr.msra.gmra.mrb[0].mxu0 %vm374_vm4, %v371_v36 }
 0x220   : > { %v447_v45 = vpop.f32.mrb[0].mxu0 }
 0x221   : > { %v448_v46 = vadd.f32 %v447_v45, %v373_v44  ;;  %v655_v47 = vpop.f32.mrb[1].mxu0 }
 0x223   : > { %v451_v49 = vmax.f32 %v448_v46, 0.0 }
 0x225   : > { %v453_v50 = vmul.f32 %v452_v48, %v451_v49 }
 0x227   : > { %665 = vmatmul.mubr.msk.f32.vlgmr.msra.gmra.mrb[0].mxu1 %vm459_vm5, %v453_v50 }
 0x2fa   : > { %v529_v52 = vpop.f32.mrb[0].mxu1 }
 0x2fb   : > { %v530_v53 = vadd.f32 %v529_v52, %v458_v51  ;;  %v666_v54 = vpop.f32.mrb[1].mxu1 }
 0x2fd   : > { %534 = vst.msk [vmem:[%s975_s7] sm:$0x1] %vm533_vm6, %v530_v53 }
 0x2fe PF: > { %s641_s15 = sshll.u32 %s833_s25, 4  ;;  %s548_s11 = sshll.u32 %s975_s7, 4  ;;  %s549_s11 = int_to_ptr.vmem [resolvable:$true] %s548_s11 }
 0x2ff   : > { %s1012_s30 = scalar_lea.hbm %s1068_s6, %s641_s15  ;;  %s536_s12 = scalar_lea.sflag [#allocation4], %s273_s14 }
 0x300   : > { %s751_s8 = scalar_lea.vmem %s549_s11, 16  ;;  %s853_s16 = smov [#allocation3]  }
 0x301   : > { %p752_p2 = scmp.ne.s32.totalorder %s549_s11, %s751_s8  ;;  %s755_s24 = sshll.u32 %s853_s16, 4  ;;  %s756_s24 = int_to_ptr.vmem [resolvable:$false] %s755_s24 }
 0x302   : > { %s757_s17 = scalar_lea.vmem %s756_s24, 32  ;;  %p758_p6 = scmp.lt.s32.totalorder %s549_s11, %s756_s24 }
 0x303   : > { %p753_p4 = pnand %p752_p2, %p938_p3  ;;  %p759_p7 = scmp.lt.s32.totalorder %s757_s17, %s751_s8 }
 0x305   : > { %p754_p5 = pneg %p753_p4  ;;  %p760_p8 = por %p759_p7, %p758_p6 }
 0x307   : > { %p761_p10 = pnand %p760_p8, %p754_p5 }
 0x309   : > { %764 = shalt.err (!%p761_p10)
}
 0x30a   : > { %s765_s25 = scalar_lea.hbm %s1012_s30, 16  ;;  %s769_s18 = scalar_lea.hbm %s1068_s6, 32 }
 0x30b   : > { %p766_p11 = scmp.ne.s32.totalorder %s1012_s30, %s765_s25  ;;  %p770_p0 = scmp.lt.u32.totalorder %s1012_s30, %s1068_s6 }
 0x30c   : > { %p771_p1 = scmp.lt.u32.totalorder %s769_s18, %s765_s25  ;;  %p773_p4 = scmp.lt.u32.totalorder %s765_s25, %s1012_s30 }
 0x30d   : > { %p767_p12 = pnand %p766_p11, %p938_p3 }
 0x30e   : > { %p772_p2 = por %p771_p1, %p770_p0 }
 0x30f   : > { %p768_p13 = pneg %p767_p12 }
 0x310   : > { %p774_p5 = por %p773_p4, %p772_p2 }
 0x312   : > { %p775_p6 = pnand %p774_p5, %p768_p13 }
 0x314   : > { %778 = shalt.err (!%p775_p6)
}
 0x315   : > { %673 = dma.vmem_to_hbm [thread:$0]  (%p938_p3), %s549_s11, 16, %s1012_s30, %s536_s12  }
 0x316 PF: > { %p679_p7 = scmp.ge.s32.totalorder %s845_s28, 2  ;;  %s560_s20 = sand.u32 1, %s817_s21  }
 0x317   : > { %s561_s29 = scalar_lea.sflag [#allocation4], %s560_s20 }
 0x318   : > { %p676_p8 = pnand %p679_p7, %p948_p9 }
 0x31a   : > { %812 = dma.done.wait (!%p676_p8), %s561_s29, 16  }
 0x31b   : > { %814 = vsyncadd (!%p676_p8), %s561_s29, 4294967280  ;;  %s19_s28 = sadd.s32 1, %s845_s28   ;;  %s1074_s9 = sld [smem:[#allocation6_spill]] }
 0x31c   : > { %p16_p10 = scmp.ge.s32.totalorder %s19_s28, 6   ;;  %s1075_s30 = sld [smem:[#allocation7_spill]] }
 0x31d   : > { %s1076_s21 = smov %s821_s22  ;;  %s1077_s22 = smov %s825_s23 }
 0x31e   : > { %s1078_s23 = smov %s956_s13  ;;  %s1079_s24 = smov %s837_s26 }
 0x31f   : > { %s1080_s25 = smov %s841_s27  ;;  %18 = sbr.rel (!%p16_p10) target bundleno = 5 (0x5), region = 90 }
 0x321   : > { %s1081_s26 = smov %s1074_s9 }
 0x322   : > { %s1082_s27 = smov %s1075_s30 }
 0x326   :  { %565 = vsyncpa [#allocation4], 1 }
 0x327   :  { %567 = vsyncpa [#allocation4 + $0x1], 1 }

</bundles_post_ra>
